<compile_context>
chip_gen: v5e
topology: v5e:2x2
jax: 0.10.0
libtpu: 0.0.40
codegen_flags: <defaults>
</compile_context>

<pallas_src>
import functools

import jax
import jax.numpy as jnp
from jax.experimental import pallas as pl
from jax.experimental.pallas import tpu as pltpu

EPS_PD = 1e-6    # F.pairwise_distance eps (added to the difference, per element)
EPS_WM = 1e-10   # weighted_mean eps


def _pairwise_loss_kernel(u_ref, v_ref, vdiag_ref, labsig_ref,
                          uidxc_ref, uidxr_ref, iidxc_ref, iidxr_ref,
                          colc_ref, colvalid_ref,
                          out_ref,
                          num_acc, den_acc, rowc_acc,
                          *, margin, d_true, d_pad):
    k = pl.program_id(1)

    @pl.when(k == 0)
    def _init():
        num_acc[...] = jnp.zeros_like(num_acc)
        den_acc[...] = jnp.zeros_like(den_acc)
        u = u_ref[...]
        # Diagonal term 0.5*||u_i - v_i + eps||^2 computed in the direct form
        # (no cancellation), minus the contribution of the zero-padded D dims
        # (each contributes (0 - 0 + eps)^2).
        dd = u - vdiag_ref[...] + EPS_PD
        raw_diag = (0.5 * jnp.sum(dd * dd, axis=-1, keepdims=True)
                    - 0.5 * (d_pad - d_true) * EPS_PD * EPS_PD)
        # Per-row constant of the Gram-matrix expansion, with the diagonal folded in:
        #   row_c_i = 0.5*||u_i||^2 + eps*sum(u_i) + 0.5*D*eps^2 - diag_i
        rowc_acc[...] = (0.5 * jnp.sum(u * u, axis=-1, keepdims=True)
                         + EPS_PD * jnp.sum(u, axis=-1, keepdims=True)
                         + 0.5 * d_true * EPS_PD * EPS_PD
                         - raw_diag)

    u = u_ref[...]                                       # (TB, D_pad)
    v = v_ref[...]                                       # (TN, D_pad)

    # MXU: -u @ v^T (contract over the embedding dim).
    neg_dot = -jax.lax.dot_general(u, v, (((1,), (1,)), ((), ())),
                                   preferred_element_type=jnp.float32)  # (TB, TN)

    # (sq_distances - diag) * label * sigma - margin, then hinge.
    score = (neg_dot + rowc_acc[...] + colc_ref[...]) * labsig_ref[...] - margin
    losses = jnp.maximum(score, 0.0)                     # (TB, TN)

    # negative_weights: mask accidental hits (same user or same item); padded
    # columns are zeroed via the column-valid mask.
    hits = ((uidxc_ref[...] == uidxr_ref[...]) |
            (iidxc_ref[...] == iidxr_ref[...]))          # (TB, TN)
    neg_w = jnp.where(hits, 0.0, colvalid_ref[...])      # (TB, TN) f32

    num_acc[...] += jnp.sum(losses * neg_w, axis=-1, keepdims=True)
    den_acc[...] += jnp.sum(neg_w, axis=-1, keepdims=True)

    @pl.when(k == pl.num_programs(1) - 1)
    def _finalize():
        # weighted_mean over items: one exact division per row, once per B block.
        out_ref[...] = num_acc[...] / (den_acc[...] + EPS_WM)


def _round_up(x, m):
    return ((x + m - 1) // m) * m


def pairwise_embedding_loss(user_embed, item_embed, *, label=None,
                            sample_weight=None, user_idx=None, item_idx=None,
                            sigma=1.0, margin=1.0, tb_max=256, tn_max=512):
    f32 = jnp.float32
    B, D = user_embed.shape
    N, Dv = item_embed.shape
    assert B <= N and D == Dv

    if label is None:
        label = jnp.ones((B,), f32)
    if sample_weight is None:
        sample_weight = jnp.ones((B,), f32)
    if user_idx is None:
        user_idx = jnp.arange(B, dtype=jnp.int32)
    if item_idx is None:
        item_idx = jnp.arange(N, dtype=jnp.int32)
    label = label.astype(f32)
    sample_weight = sample_weight.astype(f32)
    user_idx = user_idx.astype(jnp.int32)
    item_idx = item_idx.astype(jnp.int32)

    # ---- padding / tiling (lane-dense N, sublane-aligned B, MXU-aligned D) ----
    TB = min(int(tb_max), _round_up(B, 8))        # multiple of 8
    B_pad = _round_up(B, TB)
    TN = min(int(tn_max), _round_up(N, 128))      # multiple of 128
    N_pad = _round_up(max(N, B_pad), TN)          # guarantee B_pad <= N_pad
    D_pad = _round_up(D, 128)

    u_p = jnp.zeros((B_pad, D_pad), f32).at[:B, :D].set(user_embed.astype(f32))
    v_p = jnp.zeros((N_pad, D_pad), f32).at[:N, :D].set(item_embed.astype(f32))

    lab_sig = jnp.zeros((B_pad, 1), f32).at[:B, 0].set(label * f32(sigma))
    sw_p = jnp.zeros((B_pad,), f32).at[:B].set(sample_weight)   # padded rows -> 0

    uidx_col = jnp.full((B_pad, 1), -1, jnp.int32).at[:B, 0].set(user_idx)
    # F.pad(user_idx, (0, N - B)) pads with ZEROS up to N (torch quirk reproduced);
    # columns beyond N are excluded via col_valid anyway.
    uidx_row = jnp.zeros((1, N_pad), jnp.int32).at[0, :B].set(user_idx)
    iidx_col = jnp.full((B_pad, 1), -1, jnp.int32).at[:B, 0].set(item_idx[:B])
    iidx_row = jnp.full((1, N_pad), -1, jnp.int32).at[0, :N].set(item_idx)
    col_valid = jnp.zeros((1, N_pad), f32).at[0, :N].set(1.0)

    # Per-column constants of the Gram expansion (depend only on v; computed once
    # here instead of once per B block inside the kernel, and kept lane-dense).
    col_c = (0.5 * jnp.sum(v_p * v_p, axis=-1)
             - EPS_PD * jnp.sum(v_p, axis=-1)).reshape(1, N_pad)

    num_b = B_pad // TB
    num_n = N_pad // TN

    kernel = functools.partial(_pairwise_loss_kernel,
                               margin=float(margin), d_true=D, d_pad=D_pad)

    cost = pl.CostEstimate(
        flops=2 * B_pad * N_pad * D_pad,
        transcendentals=0,
        bytes_accessed=4 * (B_pad * D_pad + num_b * N_pad * D_pad
                            + 3 * num_b * N_pad + 6 * B_pad))

    row_loss = pl.pallas_call(
        kernel,
        out_shape=jax.ShapeDtypeStruct((B_pad, 1), f32),
        grid_spec=pltpu.PrefetchScalarGridSpec(
            num_scalar_prefetch=0,
            grid=(num_b, num_n),
            in_specs=[
                pl.BlockSpec((TB, D_pad), lambda b, k: (b, 0)),  # u
                pl.BlockSpec((TN, D_pad), lambda b, k: (k, 0)),  # v (streamed)
                pl.BlockSpec((TB, D_pad), lambda b, k: (b, 0)),  # v rows for diagonal
                pl.BlockSpec((TB, 1), lambda b, k: (b, 0)),      # label * sigma
                pl.BlockSpec((TB, 1), lambda b, k: (b, 0)),      # user_idx (rows)
                pl.BlockSpec((1, TN), lambda b, k: (0, k)),      # padded user_idx (cols)
                pl.BlockSpec((TB, 1), lambda b, k: (b, 0)),      # item_idx[:B] (rows)
                pl.BlockSpec((1, TN), lambda b, k: (0, k)),      # item_idx (cols)
                pl.BlockSpec((1, TN), lambda b, k: (0, k)),      # col constants
                pl.BlockSpec((1, TN), lambda b, k: (0, k)),      # col valid mask
            ],
            out_specs=pl.BlockSpec((TB, 1), lambda b, k: (b, 0)),
            scratch_shapes=[pltpu.VMEM((TB, 1), f32),   # numerator acc
                            pltpu.VMEM((TB, 1), f32),   # denominator acc
                            pltpu.VMEM((TB, 1), f32)],  # per-row constant (incl. diag)
        ),
        compiler_params=pltpu.CompilerParams(
            dimension_semantics=("parallel", "arbitrary")),
        cost_estimate=cost,
    )(u_p, v_p, v_p, lab_sig, uidx_col, uidx_row, iidx_col, iidx_row,
      col_c, col_valid)

    # weighted_mean over the batch (tiny O(B) reduce; padded rows have weight 0).
    denom = jnp.sum(sw_p) + EPS_WM
    return jnp.sum(row_loss[:, 0] * sw_p / denom)


def _reference_loss(u, v, label, sw, uidx, iidx, sigma, margin):
    """Pure-JAX transcription of the torch forward (direct form), for validation."""
    B = u.shape[0]
    N = v.shape[0]
    diff = u[:, None, :] - v[None, :, :] + EPS_PD
    sq = 0.5 * jnp.sum(diff * diff, axis=-1) * label[:, None]
    diag = jnp.diagonal(sq)[:, None]
    losses = jnp.maximum((sq - diag) * sigma - margin, 0.0)
    uidx_pad = jnp.pad(uidx, (0, N - B))
    neg_w = jnp.logical_not((uidx[:, None] == uidx_pad[None, :])
                            | (iidx[:B, None] == iidx[None, :])).astype(jnp.float32)
    row = jnp.sum(losses * neg_w / (jnp.sum(neg_w, -1, keepdims=True) + EPS_WM), -1)
    return jnp.sum(row * sw / (jnp.sum(sw) + EPS_WM))


if __name__ == "__main__":
    # Case 1: defaults (label / indices auto-generated), small shapes.
    B, N, D = 8, 16, 32
    key = jax.random.PRNGKey(0)
    ku, kv, ks = jax.random.split(key, 3)
    user_embed = jax.random.normal(ku, (B, D), dtype=jnp.float32)
    item_embed = jax.random.normal(kv, (N, D), dtype=jnp.float32)
    sample_weight = jax.random.uniform(ks, (B,), dtype=jnp.float32)

    loss = pairwise_embedding_loss(user_embed, item_embed,
                                   sample_weight=sample_weight,
                                   sigma=1.0, margin=1.0)
    loss = jax.block_until_ready(loss)
    ref = _reference_loss(user_embed, item_embed,
                          jnp.ones((B,), jnp.float32), sample_weight,
                          jnp.arange(B, dtype=jnp.int32),
                          jnp.arange(N, dtype=jnp.int32), 1.0, 1.0)
    assert jnp.allclose(loss, ref, rtol=1e-4, atol=1e-5), (loss, ref)

    # Case 2: ragged shapes, explicit label / weights / indices with collisions
    # (exercises the padding + accidental-hit masking paths).
    B2, N2, D2 = 6, 19, 40
    k1, k2, k3, k4 = jax.random.split(jax.random.PRNGKey(1), 4)
    u2 = jax.random.normal(k1, (B2, D2), dtype=jnp.float32)
    v2 = jax.random.normal(k2, (N2, D2), dtype=jnp.float32)
    lab2 = jax.random.uniform(k3, (B2,), jnp.float32, 0.5, 1.5)
    sw2 = jax.random.uniform(k4, (B2,), jnp.float32)
    uidx2 = jnp.array([0, 1, 2, 0, 3, 1], dtype=jnp.int32)
    iidx2 = jnp.arange(N2, dtype=jnp.int32) % 7

    loss2 = pairwise_embedding_loss(u2, v2, label=lab2, sample_weight=sw2,
                                    user_idx=uidx2, item_idx=iidx2,
                                    sigma=0.7, margin=0.5)
    loss2 = jax.block_until_ready(loss2)
    ref2 = _reference_loss(u2, v2, lab2, sw2, uidx2, iidx2, 0.7, 0.5)
    assert jnp.allclose(loss2, ref2, rtol=1e-4, atol=1e-5), (loss2, ref2)

    print("KERNEL_OK")
</pallas_src>

<mosaic_0001>
module attributes {stable_mosaic.version = 11 : i64} {
  func.func @_pairwise_loss_kernel(%arg0: i32, %arg1: i32, %arg2: memref<8x128xf32, #tpu.memory_space<vmem>>, %arg3: memref<128x128xf32, #tpu.memory_space<vmem>>, %arg4: memref<8x128xf32, #tpu.memory_space<vmem>>, %arg5: memref<8x1xf32, #tpu.memory_space<vmem>>, %arg6: memref<8x1xi32, #tpu.memory_space<vmem>>, %arg7: memref<1x128xi32, #tpu.memory_space<vmem>>, %arg8: memref<8x1xi32, #tpu.memory_space<vmem>>, %arg9: memref<1x128xi32, #tpu.memory_space<vmem>>, %arg10: memref<1x128xf32, #tpu.memory_space<vmem>>, %arg11: memref<1x128xf32, #tpu.memory_space<vmem>>, %arg12: memref<8x1xf32, #tpu.memory_space<vmem>>, %arg13: memref<8x1xf32, #tpu.memory_space<vmem>>, %arg14: memref<8x1xf32, #tpu.memory_space<vmem>>, %arg15: memref<8x1xf32, #tpu.memory_space<vmem>>) attributes {dimension_semantics = [#tpu.dimension_semantics<parallel>, #tpu.dimension_semantics<arbitrary>], iteration_bounds = array<i64: 1, 1>, scalar_prefetch = 0 : i64, scratch_operands = 3 : i64, tpu.core_type = #tpu.core_type<tc>, window_params = [{transform_indices = @transform_0, window_bounds = array<i64: 8, 128>}, {transform_indices = @transform_1, window_bounds = array<i64: 128, 128>}, {transform_indices = @transform_2, window_bounds = array<i64: 8, 128>}, {transform_indices = @transform_3, window_bounds = array<i64: 8, 1>}, {transform_indices = @transform_4, window_bounds = array<i64: 8, 1>}, {transform_indices = @transform_5, window_bounds = array<i64: 1, 128>}, {transform_indices = @transform_6, window_bounds = array<i64: 8, 1>}, {transform_indices = @transform_7, window_bounds = array<i64: 1, 128>}, {transform_indices = @transform_8, window_bounds = array<i64: 1, 128>}, {transform_indices = @transform_9, window_bounds = array<i64: 1, 128>}, {transform_indices = @transform_10, window_bounds = array<i64: 8, 1>}]} {
    %c0_i32 = arith.constant 0 : i32
    %0 = arith.cmpi eq, %arg1, %c0_i32 : i32
    %1 = arith.extui %0 : i1 to i32
    %c0_i32_0 = arith.constant 0 : i32
    %2 = arith.cmpi ne, %1, %c0_i32_0 : i32
    scf.if %2 {
      %cst_36 = arith.constant 0.000000e+00 : f32
      %51 = vector.broadcast %cst_36 : f32 to vector<8x1xf32>
      %c0_37 = arith.constant 0 : index
      %c0_38 = arith.constant 0 : index
      %52 = vector.load %arg13[%c0_37, %c0_38] : memref<8x1xf32, #tpu.memory_space<vmem>>, vector<8x1xf32>
      tpu.vector_store %arg13[%c0_37, %c0_38], %51 {strides = array<i32>} : memref<8x1xf32, #tpu.memory_space<vmem>>, vector<8x1xf32>,
      %cst_39 = arith.constant 0.000000e+00 : f32
      %53 = vector.broadcast %cst_39 : f32 to vector<8x1xf32>
      %c0_40 = arith.constant 0 : index
      %c0_41 = arith.constant 0 : index
      %54 = vector.load %arg14[%c0_40, %c0_41] : memref<8x1xf32, #tpu.memory_space<vmem>>, vector<8x1xf32>
      tpu.vector_store %arg14[%c0_40, %c0_41], %53 {strides = array<i32>} : memref<8x1xf32, #tpu.memory_space<vmem>>, vector<8x1xf32>,
      %c0_42 = arith.constant 0 : index
      %c0_43 = arith.constant 0 : index
      %55 = vector.load %arg2[%c0_42, %c0_43] : memref<8x128xf32, #tpu.memory_space<vmem>>, vector<8x128xf32>
      %c0_44 = arith.constant 0 : index
      %c0_45 = arith.constant 0 : index
      %56 = vector.load %arg4[%c0_44, %c0_45] : memref<8x128xf32, #tpu.memory_space<vmem>>, vector<8x128xf32>
      %57 = arith.subf %55, %56 : vector<8x128xf32>
      %cst_46 = arith.constant 9.99999997E-7 : f32
      %58 = vector.broadcast %cst_46 : f32 to vector<8x128xf32>
      %59 = arith.addf %57, %58 : vector<8x128xf32>
      %60 = arith.mulf %59, %59 : vector<8x128xf32>
      %cst_47 = arith.constant dense<0.000000e+00> : vector<8xf32>
      %61 = vector.multi_reduction <add>, %60, %cst_47 [1] : vector<8x128xf32> to vector<8xf32>
      %62 = vector.shape_cast %61 : vector<8xf32> to vector<8x1xf32>
      %cst_48 = arith.constant 5.000000e-01 : f32
      %63 = vector.broadcast %cst_48 : f32 to vector<8x1xf32>
      %64 = arith.mulf %63, %62 : vector<8x1xf32>
      %cst_49 = arith.constant 4.800000e-11 : f32
      %65 = vector.broadcast %cst_49 : f32 to vector<8x1xf32>
      %66 = arith.subf %64, %65 : vector<8x1xf32>
      %67 = arith.mulf %55, %55 : vector<8x128xf32>
      %cst_50 = arith.constant dense<0.000000e+00> : vector<8xf32>
      %68 = vector.multi_reduction <add>, %67, %cst_50 [1] : vector<8x128xf32> to vector<8xf32>
      %69 = vector.shape_cast %68 : vector<8xf32> to vector<8x1xf32>
      %cst_51 = arith.constant 5.000000e-01 : f32
      %70 = vector.broadcast %cst_51 : f32 to vector<8x1xf32>
      %71 = arith.mulf %70, %69 : vector<8x1xf32>
      %cst_52 = arith.constant dense<0.000000e+00> : vector<8xf32>
      %72 = vector.multi_reduction <add>, %55, %cst_52 [1] : vector<8x128xf32> to vector<8xf32>
      %73 = vector.shape_cast %72 : vector<8xf32> to vector<8x1xf32>
      %cst_53 = arith.constant 9.99999997E-7 : f32
      %74 = vector.broadcast %cst_53 : f32 to vector<8x1xf32>
      %75 = arith.mulf %74, %73 : vector<8x1xf32>
      %76 = arith.addf %71, %75 : vector<8x1xf32>
      %cst_54 = arith.constant 1.600000e-11 : f32
      %77 = vector.broadcast %cst_54 : f32 to vector<8x1xf32>
      %78 = arith.addf %76, %77 : vector<8x1xf32>
      %79 = arith.subf %78, %66 : vector<8x1xf32>
      %c0_55 = arith.constant 0 : index
      %c0_56 = arith.constant 0 : index
      %80 = vector.load %arg15[%c0_55, %c0_56] : memref<8x1xf32, #tpu.memory_space<vmem>>, vector<8x1xf32>
      tpu.vector_store %arg15[%c0_55, %c0_56], %79 {strides = array<i32>} : memref<8x1xf32, #tpu.memory_space<vmem>>, vector<8x1xf32>,
    } else {
    }
    %c0 = arith.constant 0 : index
    %c0_1 = arith.constant 0 : index
    %3 = vector.load %arg2[%c0, %c0_1] : memref<8x128xf32, #tpu.memory_space<vmem>>, vector<8x128xf32>
    %c0_2 = arith.constant 0 : index
    %c0_3 = arith.constant 0 : index
    %4 = vector.load %arg3[%c0_2, %c0_3] : memref<128x128xf32, #tpu.memory_space<vmem>>, vector<128x128xf32>
    %cst = arith.constant dense<0.000000e+00> : vector<8x128xf32>
    %5 = tpu.matmul %3, %4, %cst {dimension_numbers = #tpu.dot_dimension_numbers<[1], [1], [0], [0], [0, 0, 1, 0], [], []>} : vector<8x128xf32>, vector<128x128xf32>, vector<8x128xf32> -> vector<8x128xf32>
    %cst_4 = arith.constant 0.000000e+00 : f32
    %6 = vector.broadcast %cst_4 : f32 to vector<8x128xf32>
    %7 = arith.subf %6, %5 : vector<8x128xf32>
    %c0_5 = arith.constant 0 : index
    %c0_6 = arith.constant 0 : index
    %8 = vector.load %arg15[%c0_5, %c0_6] : memref<8x1xf32, #tpu.memory_space<vmem>>, vector<8x1xf32>
    %9 = vector.broadcast %8 : vector<8x1xf32> to vector<8x128xf32>
    %10 = arith.addf %7, %9 : vector<8x128xf32>
    %c0_7 = arith.constant 0 : index
    %c0_8 = arith.constant 0 : index
    %11 = vector.load %arg10[%c0_7, %c0_8] : memref<1x128xf32, #tpu.memory_space<vmem>>, vector<1x128xf32>
    %12 = vector.broadcast %11 : vector<1x128xf32> to vector<8x128xf32>
    %13 = arith.addf %10, %12 : vector<8x128xf32>
    %c0_9 = arith.constant 0 : index
    %c0_10 = arith.constant 0 : index
    %14 = vector.load %arg5[%c0_9, %c0_10] : memref<8x1xf32, #tpu.memory_space<vmem>>, vector<8x1xf32>
    %15 = vector.broadcast %14 : vector<8x1xf32> to vector<8x128xf32>
    %16 = arith.mulf %13, %15 : vector<8x128xf32>
    %cst_11 = arith.constant 1.000000e+00 : f32
    %17 = vector.broadcast %cst_11 : f32 to vector<8x128xf32>
    %18 = arith.subf %16, %17 : vector<8x128xf32>
    %cst_12 = arith.constant 0.000000e+00 : f32
    %19 = vector.broadcast %cst_12 : f32 to vector<8x128xf32>
    %20 = arith.maximumf %18, %19 : vector<8x128xf32>
    %c0_13 = arith.constant 0 : index
    %c0_14 = arith.constant 0 : index
    %21 = vector.load %arg6[%c0_13, %c0_14] : memref<8x1xi32, #tpu.memory_space<vmem>>, vector<8x1xi32>
    %c0_15 = arith.constant 0 : index
    %c0_16 = arith.constant 0 : index
    %22 = vector.load %arg7[%c0_15, %c0_16] : memref<1x128xi32, #tpu.memory_space<vmem>>, vector<1x128xi32>
    %23 = vector.broadcast %21 : vector<8x1xi32> to vector<8x128xi32>
    %24 = vector.broadcast %22 : vector<1x128xi32> to vector<8x128xi32>
    %25 = arith.cmpi eq, %23, %24 : vector<8x128xi32>
    %c0_17 = arith.constant 0 : index
    %c0_18 = arith.constant 0 : index
    %26 = vector.load %arg8[%c0_17, %c0_18] : memref<8x1xi32, #tpu.memory_space<vmem>>, vector<8x1xi32>
    %c0_19 = arith.constant 0 : index
    %c0_20 = arith.constant 0 : index
    %27 = vector.load %arg9[%c0_19, %c0_20] : memref<1x128xi32, #tpu.memory_space<vmem>>, vector<1x128xi32>
    %28 = vector.broadcast %26 : vector<8x1xi32> to vector<8x128xi32>
    %29 = vector.broadcast %27 : vector<1x128xi32> to vector<8x128xi32>
    %30 = arith.cmpi eq, %28, %29 : vector<8x128xi32>
    %31 = arith.ori %25, %30 : vector<8x128xi1>
    %c0_21 = arith.constant 0 : index
    %c0_22 = arith.constant 0 : index
    %32 = vector.load %arg11[%c0_21, %c0_22] : memref<1x128xf32, #tpu.memory_space<vmem>>, vector<1x128xf32>
    %cst_23 = arith.constant 0.000000e+00 : f32
    %33 = vector.broadcast %cst_23 : f32 to vector<8x128xf32>
    %34 = vector.shape_cast %32 : vector<1x128xf32> to vector<1x128xf32>
    %35 = vector.broadcast %34 : vector<1x128xf32> to vector<8x128xf32>
    %36 = arith.select %31, %33, %35 : vector<8x128xi1>, vector<8x128xf32>
    %c0_24 = arith.constant 0 : index
    %c0_25 = arith.constant 0 : index
    %37 = vector.load %arg13[%c0_24, %c0_25] : memref<8x1xf32, #tpu.memory_space<vmem>>, vector<8x1xf32>
    %38 = arith.mulf %20, %36 : vector<8x128xf32>
    %cst_26 = arith.constant dense<0.000000e+00> : vector<8xf32>
    %39 = vector.multi_reduction <add>, %38, %cst_26 [1] : vector<8x128xf32> to vector<8xf32>
    %40 = vector.shape_cast %39 : vector<8xf32> to vector<8x1xf32>
    %41 = arith.addf %37, %40 : vector<8x1xf32>
    %c0_27 = arith.constant 0 : index
    %c0_28 = arith.constant 0 : index
    %42 = vector.load %arg13[%c0_27, %c0_28] : memref<8x1xf32, #tpu.memory_space<vmem>>, vector<8x1xf32>
    tpu.vector_store %arg13[%c0_27, %c0_28], %41 {strides = array<i32>} : memref<8x1xf32, #tpu.memory_space<vmem>>, vector<8x1xf32>,
    %c0_29 = arith.constant 0 : index
    %c0_30 = arith.constant 0 : index
    %43 = vector.load %arg14[%c0_29, %c0_30] : memref<8x1xf32, #tpu.memory_space<vmem>>, vector<8x1xf32>
    %cst_31 = arith.constant dense<0.000000e+00> : vector<8xf32>
    %44 = vector.multi_reduction <add>, %36, %cst_31 [1] : vector<8x128xf32> to vector<8xf32>
    %45 = vector.shape_cast %44 : vector<8xf32> to vector<8x1xf32>
    %46 = arith.addf %43, %45 : vector<8x1xf32>
    %c0_32 = arith.constant 0 : index
    %c0_33 = arith.constant 0 : index
    %47 = vector.load %arg14[%c0_32, %c0_33] : memref<8x1xf32, #tpu.memory_space<vmem>>, vector<8x1xf32>
    tpu.vector_store %arg14[%c0_32, %c0_33], %46 {strides = array<i32>} : memref<8x1xf32, #tpu.memory_space<vmem>>, vector<8x1xf32>,
    %c0_i32_34 = arith.constant 0 : i32
    %48 = arith.cmpi eq, %arg1, %c0_i32_34 : i32
    %49 = arith.extui %48 : i1 to i32
    %c0_i32_35 = arith.constant 0 : i32
    %50 = arith.cmpi ne, %49, %c0_i32_35 : i32
    scf.if %50 {
      %c0_36 = arith.constant 0 : index
      %c0_37 = arith.constant 0 : index
      %51 = vector.load %arg13[%c0_36, %c0_37] : memref<8x1xf32, #tpu.memory_space<vmem>>, vector<8x1xf32>
      %c0_38 = arith.constant 0 : index
      %c0_39 = arith.constant 0 : index
      %52 = vector.load %arg14[%c0_38, %c0_39] : memref<8x1xf32, #tpu.memory_space<vmem>>, vector<8x1xf32>
      %cst_40 = arith.constant 1.000000e-10 : f32
      %53 = vector.broadcast %cst_40 : f32 to vector<8x1xf32>
      %54 = arith.addf %52, %53 : vector<8x1xf32>
      %55 = arith.divf %51, %54 : vector<8x1xf32>
      %c0_41 = arith.constant 0 : index
      %c0_42 = arith.constant 0 : index
      %56 = vector.load %arg12[%c0_41, %c0_42] : memref<8x1xf32, #tpu.memory_space<vmem>>, vector<8x1xf32>
      tpu.vector_store %arg12[%c0_41, %c0_42], %55 {strides = array<i32>} : memref<8x1xf32, #tpu.memory_space<vmem>>, vector<8x1xf32>,
    } else {
    }
    return
  }
  func.func @transform_0(%arg0: i32, %arg1: i32) -> (i32, i32) {
    %c0_i32 = arith.constant 0 : i32
    %c0_i32_0 = arith.constant 0 : i32
    return %arg0, %c0_i32 : i32, i32
  }
  func.func @transform_1(%arg0: i32, %arg1: i32) -> (i32, i32) {
    %c0_i32 = arith.constant 0 : i32
    %c0_i32_0 = arith.constant 0 : i32
    return %arg1, %c0_i32 : i32, i32
  }
  func.func @transform_2(%arg0: i32, %arg1: i32) -> (i32, i32) {
    %c0_i32 = arith.constant 0 : i32
    %c0_i32_0 = arith.constant 0 : i32
    return %arg0, %c0_i32 : i32, i32
  }
  func.func @transform_3(%arg0: i32, %arg1: i32) -> (i32, i32) {
    %c0_i32 = arith.constant 0 : i32
    %c0_i32_0 = arith.constant 0 : i32
    return %arg0, %c0_i32 : i32, i32
  }
  func.func @transform_4(%arg0: i32, %arg1: i32) -> (i32, i32) {
    %c0_i32 = arith.constant 0 : i32
    %c0_i32_0 = arith.constant 0 : i32
    return %arg0, %c0_i32 : i32, i32
  }
  func.func @transform_5(%arg0: i32, %arg1: i32) -> (i32, i32) {
    %c0_i32 = arith.constant 0 : i32
    %c0_i32_0 = arith.constant 0 : i32
    return %c0_i32, %arg1 : i32, i32
  }
  func.func @transform_6(%arg0: i32, %arg1: i32) -> (i32, i32) {
    %c0_i32 = arith.constant 0 : i32
    %c0_i32_0 = arith.constant 0 : i32
    return %arg0, %c0_i32 : i32, i32
  }
  func.func @transform_7(%arg0: i32, %arg1: i32) -> (i32, i32) {
    %c0_i32 = arith.constant 0 : i32
    %c0_i32_0 = arith.constant 0 : i32
    return %c0_i32, %arg1 : i32, i32
  }
  func.func @transform_8(%arg0: i32, %arg1: i32) -> (i32, i32) {
    %c0_i32 = arith.constant 0 : i32
    %c0_i32_0 = arith.constant 0 : i32
    return %c0_i32, %arg1 : i32, i32
  }
  func.func @transform_9(%arg0: i32, %arg1: i32) -> (i32, i32) {
    %c0_i32 = arith.constant 0 : i32
    %c0_i32_0 = arith.constant 0 : i32
    return %c0_i32, %arg1 : i32, i32
  }
  func.func @transform_10(%arg0: i32, %arg1: i32) -> (i32, i32) {
    %c0_i32 = arith.constant 0 : i32
    %c0_i32_0 = arith.constant 0 : i32
    return %arg0, %c0_i32 : i32, i32
  }
}

</mosaic_0001>

<bundles_post_ra>
// kernel: tpu_custom_call.1
= control target key start
LH: loop header
LB: loop body
LE: loop exit
PB: predicated region body
PF: predicated region fallthrough
CT: control target
= control target key end

     0   :  { %15 = vsyncpa [#allocation6], 0  ;;  %s380_s0 = inlined_call_operand.vmem [shape: f32[8,128], index: 0, kind: input, shape index: {}]   ;;  %s381_s1 = inlined_call_operand.hbm [shape: f32[128,128], index: 1, kind: input, shape index: {}]   ;;  %s382_s2 = inlined_call_operand.hbm [shape: f32[128,128], index: 2, kind: input, shape index: {}]   ;;  %s383_s3 = inlined_call_operand.vmem [shape: f32[8,1], index: 3, kind: input, shape index: {}]   ;;  %s384_s4 = inlined_call_operand.vmem [shape: s32[8,1], index: 4, kind: input, shape index: {}]   ;;  %s385_s5 = inlined_call_operand.vmem [shape: s32[1,128], index: 5, kind: input, shape index: {}]   ;;  %s386_s6 = inlined_call_operand.vmem [shape: s32[8,1], index: 6, kind: input, shape index: {}]   ;;  %s387_s7 = inlined_call_operand.vmem [shape: s32[1,128], index: 7, kind: input, shape index: {}]   ;;  %s388_s8 = inlined_call_operand.vmem [shape: f32[1,128], index: 8, kind: input, shape index: {}]   ;;  %s389_s9 = inlined_call_operand.vmem [shape: f32[1,128], index: 9, kind: input, shape index: {}]   ;;  %s390_s10 = inlined_call_operand.vmem [shape: f32[8,1], index: 10, kind: output, shape index: {}]  }
   0x1   :  { %s23_s15 = sshll.u32 %s381_s1, 4  ;;  %s24_s15 = int_to_ptr.hbm [resolvable:$true] %s23_s15 }
   0x2   :  { %16 = vsyncpa [#allocation8], 0  ;;  %s280_s16 = smov [#allocation5]   ;;  %s37_s20 = sshll.u32 %s382_s2, 4  ;;  %s38_s20 = int_to_ptr.hbm [resolvable:$true] %s37_s20 }
   0x3   :  { %s25_s17 = sshll.u32 %s280_s16, 4  ;;  %s281_s21 = smov 128   ;;  %s26_s17 = int_to_ptr.vmem [resolvable:$true] %s25_s17 }
   0x4   :  { %s282_s22 = smov 8   ;;  %s283_s23 = smov [#allocation7]  }
   0x5   :  { %31 = dma.hbm_to_vmem [thread:$0]  %s24_s15, 2048, %s26_s17, [#allocation6], %s281_s21, %s281_s21, %s282_s22  }
   0x6   :  { %s39_s24 = sshll.u32 %s283_s23, 4  ;;  %s40_s24 = int_to_ptr.vmem [resolvable:$true] %s39_s24 }
   0x7   :  { %42 = dma.hbm_to_vmem [thread:$0]  %s38_s20, 128, %s40_s24, [#allocation8]  }
   0x8   :  { %276 = dma.done.wait [#allocation6], 2048  }
   0x9   :  { %277 = vsyncadd [#allocation6], 4294965248 }
   0xa   :  { %278 = dma.done.wait [#allocation8], 128  }
   0xb   :  { %279 = vsyncadd [#allocation8], 4294967168  ;;  %v72_v0 = vld [vmem:[%s380_s0] sm:$0xff]  ;;  %v73_v1 = vld [vmem:[#allocation7] sm:$0xff]  ;;  %v284_v12 = vmov 0   ;;  %vm69_vm0 = vcmask 7168  }
   0xc   :  { %v108_v2 = vld [vmem:[#allocation5 + $0x78] sm:$0xff]  ;;  %v81_v3 = vmul.f32 %v72_v0, %v72_v0  ;;  %v74_v4 = vsub.f32 %v72_v0, %v73_v1  ;;  %v107_v5 = vld [vmem:[#allocation5 + $0x70] sm:$0xff]  ;;  %v106_v8 = vld [vmem:[#allocation5 + $0x68] sm:$0xff]  ;;  %219 = vset.pattern.permute.xlu1 %v284_v12  ;;  %220 = vset.pattern.permute.xlu2 %v284_v12  ;;  %v285_v43 = vmov 0.0  }
   0xd   :  { %109 = vmatpush.xpose.msra.mxu0 %v108_v2  ;;  %v105_v9 = vld [vmem:[#allocation5 + $0x60] sm:$0xff]  ;;  %v104_v10 = vld [vmem:[#allocation5 + $0x58] sm:$0xff]  ;;  %v103_v11 = vld [vmem:[#allocation5 + $0x50] sm:$0xff]  ;;  %221 = vset.pattern.permute.xlu0 %v284_v12  ;;  %71 = vst.msk [vmem:[#allocation3] sm:$0xff] %vm69_vm0, %v285_v43 }
   0xe   :  { %82 = vadd.xlane.f32.xlu0 %v81_v3  ;;  %v75_v6 = vadd.f32 1e-06, %v74_v4  ;;  %v102_v13 = vld [vmem:[#allocation5 + $0x48] sm:$0xff]  ;;  %v101_v14 = vld [vmem:[#allocation5 + $0x40] sm:$0xff]  ;;  %v100_v16 = vld [vmem:[#allocation5 + $0x38] sm:$0xff]  ;;  %70 = vst.msk [vmem:[#allocation2] sm:$0xff] %vm69_vm0, %v285_v43 }
   0xf   :  { %v151_v15 = vld [vmem:[%s384_s4] sm:$0xff]  ;;  %v99_v17 = vld [vmem:[#allocation5 + $0x30] sm:$0xff]  ;;  %v97_v19 = vld [vmem:[#allocation5 + $0x20] sm:$0xff] }
  0x10   :  { %v76_v7 = vmul.f32 %v75_v6, %v75_v6  ;;  %v98_v18 = vld [vmem:[#allocation5 + $0x28] sm:$0xff]  ;;  %v96_v20 = vld [vmem:[#allocation5 + $0x18] sm:$0xff]  ;;  %v95_v21 = vld [vmem:[#allocation5 + $0x10] sm:$0xff] }
  0x11   :  { %110 = vmatpush.xpose.msra.mxu0 %v107_v5  ;;  %v94_v22 = vld [vmem:[#allocation5 + $0x8] sm:$0xff]  ;;  %v93_v23 = vld [vmem:[#allocation5] sm:$0xff] }
  0x12   :  { %77 = vadd.xlane.f32.xlu1 %v76_v7  ;;  %v158_v24 = vld [vmem:[%s386_s6] sm:$0xff] }
  0x13   :  { %v142_v25 = vld [vmem:[%s383_s3] sm:$0xff]  ;;  %161 = vperm.xlu2 %220, %v158_v24  }
  0x14   :  { %v223_v37 = vld [vmem:[%s385_s5] ss:$0 sm:$0xff]  ;;  %v178_v55 = vld [vmem:[#allocation3] sm:$0xff] }
  0x15   :  { %111 = vmatpush.xpose.msra.mxu0 %v106_v8  ;;  %v222_v39 = vld [vmem:[%s387_s7] ss:$0 sm:$0xff] }
  0x16   :  { %85 = vadd.xlane.f32.xlu0 %v72_v0  ;;  %v224_v40 = vld [vmem:[%s389_s9] ss:$0 sm:$0xff] }
  0x17   :  { %v225_v46 = vld [vmem:[%s388_s8] ss:$0 sm:$0xff] }
  0x18   :  { %v171_v63 = vld [vmem:[#allocation2] sm:$0xff] }
  0x19   :  { %112 = vmatpush.xpose.msra.mxu0 %v105_v9 }
  0x1d   :  { %113 = vmatpush.xpose.msra.mxu0 %v104_v10 }
  0x21   :  { %114 = vmatpush.xpose.msra.mxu0 %v103_v11 }
  0x25   :  { %115 = vmatpush.xpose.msra.mxu0 %v102_v13 }
  0x29   :  { %116 = vmatpush.xpose.msra.mxu0 %v101_v14 }
  0x2a   :  { %145 = vperm.xlu0 %221, %v142_v25  }
  0x2b   :  { %154 = vperm.xlu1 %219, %v151_v15  }
  0x2d   :  { %117 = vmatpush.xpose.msra.mxu0 %v100_v16 }
  0x31   :  { %118 = vmatpush.xpose.msra.mxu0 %v99_v17 }
  0x35   :  { %119 = vmatpush.xpose.msra.mxu0 %v98_v18 }
  0x39   :  { %120 = vmatpush.xpose.msra.mxu0 %v97_v19 }
  0x3d   :  { %121 = vmatpush.xpose.msra.mxu0 %v96_v20 }
  0x41   :  { %122 = vmatpush.xpose.msra.mxu0 %v95_v21 }
  0x45   :  { %123 = vmatpush.xpose.msra.mxu0 %v94_v22 }
  0x49   :  { %124 = vmatpush.xpose.msra.mxu0 %v93_v23 }
  0x4c   :  { %125 = vmatmul.f32.vlgmr.msra.gmra.mxu0 %v72_v0 }
  0x6d   :  { %v162_v41 = vpop.permute.xlu2 %161 }
  0x6e   :  { %vm164_vm2 = vcmp.eq.s32.totalorder %v162_v41, %v222_v39 }
  0x81   :  { %v83_v26 = vpop.xlane.xlu0 %82 }
  0x82   :  { %v84_v30 = vmul.f32 0.5, %v83_v26 }
  0x85   :  { %v78_v27 = vpop.xlane.xlu1 %77 }
  0x86   :  { %v79_v28 = vmul.f32 0.5, %v78_v27 }
  0x88   :  { %v211_v33 = vadd.f32 -4.8e-11, %v79_v28 }
  0x89   :  { %v86_v29 = vpop.xlane.xlu0 %85 }
  0x8a   :  { %v87_v31 = vmul.f32 1e-06, %v86_v29 }
  0x8c   :  { %v88_v32 = vadd.f32 %v87_v31, %v84_v30 }
  0x8e   :  { %v89_v34 = vadd.f32 1.6e-11, %v88_v32 }
  0x90   :  { %v90_v35 = vsub.f32 %v89_v34, %v211_v33 }
  0x92   :  { %91 = vst.msk [vmem:[#allocation4] sm:$0xff] %vm69_vm0, %v90_v35 }
  0x99   :  { %v130_v36 = vld [vmem:[#allocation4] sm:$0xff] }
  0x9a   :  { %133 = vperm.xlu2 %220, %v130_v36  }
  0x9c   :  { %v146_v49 = vpop.permute.xlu0 %145 }
  0x9d   :  { %v155_v38 = vpop.permute.xlu1 %154 }
  0x9e   :  { %vm157_vm1 = vcmp.eq.s32.totalorder %v155_v38, %v223_v37 }
  0x9f   :  { %vm165_vm3 = vmor %vm157_vm1, %vm164_vm2 }
  0xa0   :  { %v170_v42 = vsel %vm165_vm3, 0.0, %v224_v40 }
  0xc3   :  { %179 = vadd.xlane.f32.xlu2 %v170_v42 }
  0xc9   :  { %v126_v44 = vpop.f32.mrf.mxu0 }
  0xca   :  { %v129_v45 = vsub.f32 0.0, %v126_v44 }
  0xf4   :  { %v134_v47 = vpop.permute.xlu2 %133 }
  0xf5   :  { %v136_v48 = vadd.f32 %v134_v47, %v129_v45 }
  0xf7   :  { %v141_v50 = vadd.f32 %v225_v46, %v136_v48 }
  0xf9   :  { %v148_v51 = vmul.f32 %v146_v49, %v141_v50 }
  0xfb   :  { %v212_v52 = vadd.f32 -1.0, %v148_v51 }
  0xfd   :  { %v150_v53 = vmax.f32 %v212_v52, 0.0 }
  0xff   :  { %v172_v54 = vmul.f32 %v170_v42, %v150_v53 }
 0x101   :  { %173 = vadd.xlane.f32.xlu1 %v172_v54 }
 0x136   :  { %v180_v56 = vpop.xlane.xlu2 %179 }
 0x137   :  { %v181_v57 = vadd.f32 %v180_v56, %v178_v55 }
 0x139   :  { %182 = vst.msk [vmem:[#allocation3] sm:$0xff] %vm69_vm0, %v181_v57 }
 0x140   :  { %v187_v58 = vld [vmem:[#allocation3] sm:$0xff] }
 0x141   :  { %v188_v59 = vadd.f32 1e-10, %v187_v58 }
 0x143   :  { %226 = vrcp.f32 %v188_v59  ;;  %vm194_vm4 = vweird.f32 %v188_v59  ;;  %v200_v3 = vand.u32 2147483648, %v188_v59  ;;  %v198_v5 = vand.u32 2147483647, %v188_v59 }
 0x145   :  { %v201_v6 = vor.u32 1.1754944e-38, %v200_v3  ;;  %vm199_vm7 = vcmp.eq.f32.partialorder %v198_v5, 8.507059e+37 }
 0x149   :  { %v227_v60 = vpop.eup %226 }
 0x14a   :  { %v190_v61 = vmul.f32 %v227_v60, %v188_v59  ;;  %vm195_vm5 = vweird.f32 %v227_v60 }
 0x14b   :  { %vm196_vm6 = vmor %vm194_vm4, %vm195_vm5 }
 0x14c   :  { %v191_v62 = vsub.f32 1.0, %v190_v61 }
 0x14e   :  { %v192_v0 = vmul.f32 %v227_v60, %v191_v62 }
 0x150   :  { %v193_v4 = vadd.f32 %v227_v60, %v192_v0 }
 0x152   :  { %v197_v7 = vsel %vm196_vm6, %v227_v60, %v193_v4 }
 0x153   :  { %v202_v9 = vsel %vm199_vm7, %v201_v6, %v197_v7 }
 0x174   :  { %v174_v1 = vpop.xlane.xlu1 %173 }
 0x175   :  { %v175_v2 = vadd.f32 %v174_v1, %v171_v63 }
 0x177   :  { %177 = vst.msk [vmem:[#allocation2] sm:$0xff] %vm69_vm0, %v175_v2 }
 0x17e   :  { %v186_v8 = vld [vmem:[#allocation2] sm:$0xff] }
 0x17f   :  { %v203_v10 = vmul.f32 %v202_v9, %v186_v8 }
 0x181   :  { %204 = vst.msk [vmem:[%s390_s10] sm:$0xff] %vm69_vm0, %v203_v10 }
 0x182   :  { %209 = vsyncpa [#allocation6], 1 }
 0x183   :  { %210 = vsyncpa [#allocation8], 1 }

</bundles_post_ra>
